<compile_context>
chip_gen: v6e
topology: v6e:2x2x1
jax: 0.10.0
libtpu: 0.0.40
codegen_flags: <defaults>
</compile_context>

<pallas_src>
import jax
import jax.numpy as jnp
from jax.experimental import pallas as pl
from jax.experimental.pallas import tpu as pltpu


_LN_EPS = 1e-5
_INPUT_DIM = 3      # per-branch input features (position/orientation/velocity/scalars)
_HIDDEN_DIM = 32
_OUTPUT_DIM = 16
_NUM_BRANCHES = 4


def _round_up(x, m):
    return ((x + m - 1) // m) * m


# ----------------------------------------------------------------------------
# Fused kernel: one row-tile of the whole FeatureEmbedding forward.
#   x_ref:    [tm, 12]
#   w1/b1:    [12, 128] / [1, 128]
#   w2/b2:    [128, 128] / [1, 128]
#   w3/b3:    [128, 64] / [1, 64]
#   gamma/beta: [1, 64]
#   p_ref:    [64, 64]  block-averaging matrix for per-16-group LayerNorm
#   o_ref:    [tm, 64]
# ----------------------------------------------------------------------------
def _fused_kernel(x_ref, w1_ref, b1_ref, w2_ref, b2_ref, w3_ref, b3_ref,
                  gamma_ref, beta_ref, p_ref, o_ref):
    x = x_ref[...]
    h = jnp.dot(x, w1_ref[...], preferred_element_type=jnp.float32) + b1_ref[...]
    h = jnp.maximum(h, 0.0)
    h = jnp.dot(h, w2_ref[...], preferred_element_type=jnp.float32) + b2_ref[...]
    h = jnp.maximum(h, 0.0)
    y = jnp.dot(h, w3_ref[...], preferred_element_type=jnp.float32) + b3_ref[...]

    # Per-branch LayerNorm over groups of 16 lanes via block-averaging matmul.
    mean = jnp.dot(y, p_ref[...], preferred_element_type=jnp.float32)
    yc = y - mean
    var = jnp.dot(yc * yc, p_ref[...], preferred_element_type=jnp.float32)
    inv = jax.lax.rsqrt(var + _LN_EPS)
    o_ref[...] = (yc * inv * gamma_ref[...] + beta_ref[...]).astype(o_ref.dtype)


def _fused_feature_embedding(x2d, fused):
    """x2d: [M, 12] -> [M, 64] via a single tiled Pallas kernel."""
    M, fdim = x2d.shape
    k1, h4 = fused["w1"].shape        # (12, 128)
    _, o4 = fused["w3"].shape         # (128, 64)
    assert fdim == k1

    tm = 256 if M >= 256 else _round_up(M, 8)
    mp = _round_up(M, tm)
    if mp != M:
        x2d = jnp.pad(x2d, ((0, mp - M), (0, 0)))

    out = pl.pallas_call(
        _fused_kernel,
        out_shape=jax.ShapeDtypeStruct((mp, o4), jnp.float32),
        grid_spec=pltpu.PrefetchScalarGridSpec(
            num_scalar_prefetch=0,
            grid=(mp // tm,),
            in_specs=[
                pl.BlockSpec((tm, fdim), lambda i: (i, 0)),   # activations (tiled over M)
                pl.BlockSpec((fdim, h4), lambda i: (0, 0)),   # W1 (resident)
                pl.BlockSpec((1, h4), lambda i: (0, 0)),      # b1
                pl.BlockSpec((h4, h4), lambda i: (0, 0)),     # W2
                pl.BlockSpec((1, h4), lambda i: (0, 0)),      # b2
                pl.BlockSpec((h4, o4), lambda i: (0, 0)),     # W3
                pl.BlockSpec((1, o4), lambda i: (0, 0)),      # b3
                pl.BlockSpec((1, o4), lambda i: (0, 0)),      # gamma
                pl.BlockSpec((1, o4), lambda i: (0, 0)),      # beta
                pl.BlockSpec((o4, o4), lambda i: (0, 0)),     # P (group-average)
            ],
            out_specs=pl.BlockSpec((tm, o4), lambda i: (i, 0)),
        ),
        compiler_params=pltpu.CompilerParams(
            dimension_semantics=("parallel",),
            vmem_limit_bytes=64 * 1024 * 1024,
        ),
    )(x2d, fused["w1"], fused["b1"], fused["w2"], fused["b2"],
      fused["w3"], fused["b3"], fused["gamma"], fused["beta"], fused["p"])
    return out[:M]


@jax.jit
def feature_embedding_forward(data, fused):
    """data: [B, T, 12] -> [B, T, 64] (matches FeatureEmbedding.forward)."""
    B, T, F = data.shape
    x2d = data.reshape(B * T, F)
    out = _fused_feature_embedding(x2d, fused)
    return out.reshape(B, T, -1)


# ----------------------------------------------------------------------------
# Deterministic parameter init (per-branch, PyTorch-like Linear init) and
# block-diagonal fusion for the kernel.
# ----------------------------------------------------------------------------
def init_params(key):
    def linear(k, fan_in, fan_out):
        kw, kb = jax.random.split(k)
        bound = 1.0 / (fan_in ** 0.5)
        w = jax.random.uniform(kw, (fan_in, fan_out), jnp.float32, -bound, bound)
        b = jax.random.uniform(kb, (fan_out,), jnp.float32, -bound, bound)
        return w, b

    branches = []
    for kb in jax.random.split(key, _NUM_BRANCHES):
        k1, k2, k3, k4, k5 = jax.random.split(kb, 5)
        w1, b1 = linear(k1, _INPUT_DIM, _HIDDEN_DIM)
        w2, b2 = linear(k2, _HIDDEN_DIM, _HIDDEN_DIM)
        w3, b3 = linear(k3, _HIDDEN_DIM, _OUTPUT_DIM)
        gamma = 1.0 + 0.1 * jax.random.normal(k4, (_OUTPUT_DIM,), jnp.float32)
        beta = 0.1 * jax.random.normal(k5, (_OUTPUT_DIM,), jnp.float32)
        branches.append(dict(w1=w1, b1=b1, w2=w2, b2=b2, w3=w3, b3=b3,
                             gamma=gamma, beta=beta))
    return branches


def build_fused(branches):
    nb = len(branches)
    i_d, h_d, o_d = _INPUT_DIM, _HIDDEN_DIM, _OUTPUT_DIM
    w1 = jnp.zeros((nb * i_d, nb * h_d), jnp.float32)
    w2 = jnp.zeros((nb * h_d, nb * h_d), jnp.float32)
    w3 = jnp.zeros((nb * h_d, nb * o_d), jnp.float32)
    b1, b2, b3, g, be = [], [], [], [], []
    for i, p in enumerate(branches):
        w1 = w1.at[i * i_d:(i + 1) * i_d, i * h_d:(i + 1) * h_d].set(p["w1"])
        w2 = w2.at[i * h_d:(i + 1) * h_d, i * h_d:(i + 1) * h_d].set(p["w2"])
        w3 = w3.at[i * h_d:(i + 1) * h_d, i * o_d:(i + 1) * o_d].set(p["w3"])
        b1.append(p["b1"]); b2.append(p["b2"]); b3.append(p["b3"])
        g.append(p["gamma"]); be.append(p["beta"])
    return dict(
        w1=w1, w2=w2, w3=w3,
        b1=jnp.concatenate(b1).reshape(1, -1),
        b2=jnp.concatenate(b2).reshape(1, -1),
        b3=jnp.concatenate(b3).reshape(1, -1),
        gamma=jnp.concatenate(g).reshape(1, -1),
        beta=jnp.concatenate(be).reshape(1, -1),
        p=jnp.kron(jnp.eye(nb, dtype=jnp.float32),
                   jnp.ones((o_d, o_d), jnp.float32) / float(o_d)),
    )


# ----------------------------------------------------------------------------
# Pure-JAX reference (mirrors the PyTorch module branch-by-branch).
# ----------------------------------------------------------------------------
def reference_forward(data, branches):
    B, T, F = data.shape
    x = data.reshape(B * T, F)
    outs = []
    for i, p in enumerate(branches):
        xb = x[:, 3 * i:3 * i + 3]
        h = jnp.maximum(xb @ p["w1"] + p["b1"], 0.0)
        h = jnp.maximum(h @ p["w2"] + p["b2"], 0.0)
        y = h @ p["w3"] + p["b3"]
        mu = jnp.mean(y, axis=-1, keepdims=True)
        var = jnp.mean((y - mu) ** 2, axis=-1, keepdims=True)
        y = (y - mu) * jax.lax.rsqrt(var + _LN_EPS) * p["gamma"] + p["beta"]
        outs.append(y)
    return jnp.concatenate(outs, axis=-1).reshape(B, T, -1)


# ----------------------------------------------------------------------------
if __name__ == "__main__":
    key = jax.random.PRNGKey(0)
    k_data, k_params = jax.random.split(key)

    B, T = 2, 8  # data: [B, T, 12] -> output [B, T, 64]
    data = jax.random.normal(k_data, (B, T, 4 * _INPUT_DIM), jnp.float32)

    branches = init_params(k_params)
    fused = build_fused(branches)

    out = feature_embedding_forward(data, fused)
    out = jax.block_until_ready(out)

    ref = reference_forward(data, branches)

    assert out.shape == (B, T, _NUM_BRANCHES * _OUTPUT_DIM), out.shape
    assert bool(jnp.all(jnp.isfinite(out)))
    assert bool(jnp.allclose(out, ref, atol=2e-5, rtol=2e-5)), \
        float(jnp.max(jnp.abs(out - ref)))
    print("KERNEL_OK")
</pallas_src>

<mosaic_0001>
module attributes {stable_mosaic.version = 11 : i64} {
  func.func @_fused_kernel(%arg0: i32, %arg1: memref<16x12xf32, #tpu.memory_space<vmem>>, %arg2: memref<12x128xf32, #tpu.memory_space<vmem>>, %arg3: memref<1x128xf32, #tpu.memory_space<vmem>>, %arg4: memref<128x128xf32, #tpu.memory_space<vmem>>, %arg5: memref<1x128xf32, #tpu.memory_space<vmem>>, %arg6: memref<128x64xf32, #tpu.memory_space<vmem>>, %arg7: memref<1x64xf32, #tpu.memory_space<vmem>>, %arg8: memref<1x64xf32, #tpu.memory_space<vmem>>, %arg9: memref<1x64xf32, #tpu.memory_space<vmem>>, %arg10: memref<64x64xf32, #tpu.memory_space<vmem>>, %arg11: memref<16x64xf32, #tpu.memory_space<vmem>>) attributes {dimension_semantics = [#tpu.dimension_semantics<parallel>], iteration_bounds = array<i64: 1>, scalar_prefetch = 0 : i64, scratch_operands = 0 : i64, tpu.core_type = #tpu.core_type<tc>, window_params = [{transform_indices = @transform_0, window_bounds = array<i64: 16, 12>}, {pipeline_mode = #tpu.pipeline_mode<synchronous>, transform_indices = @transform_1, window_bounds = array<i64: 12, 128>}, {pipeline_mode = #tpu.pipeline_mode<synchronous>, transform_indices = @transform_2, window_bounds = array<i64: 1, 128>}, {pipeline_mode = #tpu.pipeline_mode<synchronous>, transform_indices = @transform_3, window_bounds = array<i64: 128, 128>}, {pipeline_mode = #tpu.pipeline_mode<synchronous>, transform_indices = @transform_4, window_bounds = array<i64: 1, 128>}, {pipeline_mode = #tpu.pipeline_mode<synchronous>, transform_indices = @transform_5, window_bounds = array<i64: 128, 64>}, {pipeline_mode = #tpu.pipeline_mode<synchronous>, transform_indices = @transform_6, window_bounds = array<i64: 1, 64>}, {pipeline_mode = #tpu.pipeline_mode<synchronous>, transform_indices = @transform_7, window_bounds = array<i64: 1, 64>}, {pipeline_mode = #tpu.pipeline_mode<synchronous>, transform_indices = @transform_8, window_bounds = array<i64: 1, 64>}, {pipeline_mode = #tpu.pipeline_mode<synchronous>, transform_indices = @transform_9, window_bounds = array<i64: 64, 64>}, {transform_indices = @transform_10, window_bounds = array<i64: 16, 64>}]} {
    %c0 = arith.constant 0 : index
    %c0_0 = arith.constant 0 : index
    %0 = vector.load %arg1[%c0, %c0_0] : memref<16x12xf32, #tpu.memory_space<vmem>>, vector<16x12xf32>
    %c0_1 = arith.constant 0 : index
    %c0_2 = arith.constant 0 : index
    %1 = vector.load %arg2[%c0_1, %c0_2] : memref<12x128xf32, #tpu.memory_space<vmem>>, vector<12x128xf32>
    %cst = arith.constant dense<0.000000e+00> : vector<16x128xf32>
    %2 = tpu.matmul %0, %1, %cst {dimension_numbers = #tpu.dot_dimension_numbers<[1], [0], [0], [1], [0, 0, 1, 1], [], []>} : vector<16x12xf32>, vector<12x128xf32>, vector<16x128xf32> -> vector<16x128xf32>
    %c0_3 = arith.constant 0 : index
    %c0_4 = arith.constant 0 : index
    %3 = vector.load %arg3[%c0_3, %c0_4] : memref<1x128xf32, #tpu.memory_space<vmem>>, vector<1x128xf32>
    %4 = vector.broadcast %3 : vector<1x128xf32> to vector<16x128xf32>
    %5 = arith.addf %2, %4 : vector<16x128xf32>
    %cst_5 = arith.constant 0.000000e+00 : f32
    %6 = vector.broadcast %cst_5 : f32 to vector<16x128xf32>
    %7 = arith.maximumf %5, %6 : vector<16x128xf32>
    %c0_6 = arith.constant 0 : index
    %c0_7 = arith.constant 0 : index
    %8 = vector.load %arg4[%c0_6, %c0_7] : memref<128x128xf32, #tpu.memory_space<vmem>>, vector<128x128xf32>
    %cst_8 = arith.constant dense<0.000000e+00> : vector<16x128xf32>
    %9 = tpu.matmul %7, %8, %cst_8 {dimension_numbers = #tpu.dot_dimension_numbers<[1], [0], [0], [1], [0, 0, 1, 1], [], []>} : vector<16x128xf32>, vector<128x128xf32>, vector<16x128xf32> -> vector<16x128xf32>
    %c0_9 = arith.constant 0 : index
    %c0_10 = arith.constant 0 : index
    %10 = vector.load %arg5[%c0_9, %c0_10] : memref<1x128xf32, #tpu.memory_space<vmem>>, vector<1x128xf32>
    %11 = vector.broadcast %10 : vector<1x128xf32> to vector<16x128xf32>
    %12 = arith.addf %9, %11 : vector<16x128xf32>
    %cst_11 = arith.constant 0.000000e+00 : f32
    %13 = vector.broadcast %cst_11 : f32 to vector<16x128xf32>
    %14 = arith.maximumf %12, %13 : vector<16x128xf32>
    %c0_12 = arith.constant 0 : index
    %c0_13 = arith.constant 0 : index
    %15 = vector.load %arg6[%c0_12, %c0_13] : memref<128x64xf32, #tpu.memory_space<vmem>>, vector<128x64xf32>
    %cst_14 = arith.constant dense<0.000000e+00> : vector<16x64xf32>
    %16 = tpu.matmul %14, %15, %cst_14 {dimension_numbers = #tpu.dot_dimension_numbers<[1], [0], [0], [1], [0, 0, 1, 1], [], []>} : vector<16x128xf32>, vector<128x64xf32>, vector<16x64xf32> -> vector<16x64xf32>
    %c0_15 = arith.constant 0 : index
    %c0_16 = arith.constant 0 : index
    %17 = vector.load %arg7[%c0_15, %c0_16] : memref<1x64xf32, #tpu.memory_space<vmem>>, vector<1x64xf32>
    %18 = vector.broadcast %17 : vector<1x64xf32> to vector<16x64xf32>
    %19 = arith.addf %16, %18 : vector<16x64xf32>
    %c0_17 = arith.constant 0 : index
    %c0_18 = arith.constant 0 : index
    %20 = vector.load %arg10[%c0_17, %c0_18] : memref<64x64xf32, #tpu.memory_space<vmem>>, vector<64x64xf32>
    %cst_19 = arith.constant dense<0.000000e+00> : vector<16x64xf32>
    %21 = tpu.matmul %19, %20, %cst_19 {dimension_numbers = #tpu.dot_dimension_numbers<[1], [0], [0], [1], [0, 0, 1, 1], [], []>} : vector<16x64xf32>, vector<64x64xf32>, vector<16x64xf32> -> vector<16x64xf32>
    %22 = arith.subf %19, %21 : vector<16x64xf32>
    %23 = arith.mulf %22, %22 : vector<16x64xf32>
    %c0_20 = arith.constant 0 : index
    %c0_21 = arith.constant 0 : index
    %24 = vector.load %arg10[%c0_20, %c0_21] : memref<64x64xf32, #tpu.memory_space<vmem>>, vector<64x64xf32>
    %cst_22 = arith.constant dense<0.000000e+00> : vector<16x64xf32>
    %25 = tpu.matmul %23, %24, %cst_22 {dimension_numbers = #tpu.dot_dimension_numbers<[1], [0], [0], [1], [0, 0, 1, 1], [], []>} : vector<16x64xf32>, vector<64x64xf32>, vector<16x64xf32> -> vector<16x64xf32>
    %cst_23 = arith.constant 9.99999974E-6 : f32
    %26 = vector.broadcast %cst_23 : f32 to vector<16x64xf32>
    %27 = arith.addf %25, %26 : vector<16x64xf32>
    %28 = math.rsqrt %27 : vector<16x64xf32>
    %29 = arith.mulf %22, %28 : vector<16x64xf32>
    %c0_24 = arith.constant 0 : index
    %c0_25 = arith.constant 0 : index
    %30 = vector.load %arg8[%c0_24, %c0_25] : memref<1x64xf32, #tpu.memory_space<vmem>>, vector<1x64xf32>
    %31 = vector.broadcast %30 : vector<1x64xf32> to vector<16x64xf32>
    %32 = arith.mulf %29, %31 : vector<16x64xf32>
    %c0_26 = arith.constant 0 : index
    %c0_27 = arith.constant 0 : index
    %33 = vector.load %arg9[%c0_26, %c0_27] : memref<1x64xf32, #tpu.memory_space<vmem>>, vector<1x64xf32>
    %34 = vector.broadcast %33 : vector<1x64xf32> to vector<16x64xf32>
    %35 = arith.addf %32, %34 : vector<16x64xf32>
    %c0_28 = arith.constant 0 : index
    %c0_29 = arith.constant 0 : index
    %36 = vector.load %arg11[%c0_28, %c0_29] : memref<16x64xf32, #tpu.memory_space<vmem>>, vector<16x64xf32>
    tpu.vector_store %arg11[%c0_28, %c0_29], %35 {strides = array<i32>} : memref<16x64xf32, #tpu.memory_space<vmem>>, vector<16x64xf32>,
    return
  }
  func.func @transform_0(%arg0: i32) -> (i32, i32) {
    %c0_i32 = arith.constant 0 : i32
    %c0_i32_0 = arith.constant 0 : i32
    return %arg0, %c0_i32 : i32, i32
  }
  func.func @transform_1(%arg0: i32) -> (i32, i32) {
    %c0_i32 = arith.constant 0 : i32
    %c0_i32_0 = arith.constant 0 : i32
    %c0_i32_1 = arith.constant 0 : i32
    return %c0_i32, %c0_i32_0 : i32, i32
  }
  func.func @transform_2(%arg0: i32) -> (i32, i32) {
    %c0_i32 = arith.constant 0 : i32
    %c0_i32_0 = arith.constant 0 : i32
    %c0_i32_1 = arith.constant 0 : i32
    return %c0_i32, %c0_i32_0 : i32, i32
  }
  func.func @transform_3(%arg0: i32) -> (i32, i32) {
    %c0_i32 = arith.constant 0 : i32
    %c0_i32_0 = arith.constant 0 : i32
    %c0_i32_1 = arith.constant 0 : i32
    return %c0_i32, %c0_i32_0 : i32, i32
  }
  func.func @transform_4(%arg0: i32) -> (i32, i32) {
    %c0_i32 = arith.constant 0 : i32
    %c0_i32_0 = arith.constant 0 : i32
    %c0_i32_1 = arith.constant 0 : i32
    return %c0_i32, %c0_i32_0 : i32, i32
  }
  func.func @transform_5(%arg0: i32) -> (i32, i32) {
    %c0_i32 = arith.constant 0 : i32
    %c0_i32_0 = arith.constant 0 : i32
    %c0_i32_1 = arith.constant 0 : i32
    return %c0_i32, %c0_i32_0 : i32, i32
  }
  func.func @transform_6(%arg0: i32) -> (i32, i32) {
    %c0_i32 = arith.constant 0 : i32
    %c0_i32_0 = arith.constant 0 : i32
    %c0_i32_1 = arith.constant 0 : i32
    return %c0_i32, %c0_i32_0 : i32, i32
  }
  func.func @transform_7(%arg0: i32) -> (i32, i32) {
    %c0_i32 = arith.constant 0 : i32
    %c0_i32_0 = arith.constant 0 : i32
    %c0_i32_1 = arith.constant 0 : i32
    return %c0_i32, %c0_i32_0 : i32, i32
  }
  func.func @transform_8(%arg0: i32) -> (i32, i32) {
    %c0_i32 = arith.constant 0 : i32
    %c0_i32_0 = arith.constant 0 : i32
    %c0_i32_1 = arith.constant 0 : i32
    return %c0_i32, %c0_i32_0 : i32, i32
  }
  func.func @transform_9(%arg0: i32) -> (i32, i32) {
    %c0_i32 = arith.constant 0 : i32
    %c0_i32_0 = arith.constant 0 : i32
    %c0_i32_1 = arith.constant 0 : i32
    return %c0_i32, %c0_i32_0 : i32, i32
  }
  func.func @transform_10(%arg0: i32) -> (i32, i32) {
    %c0_i32 = arith.constant 0 : i32
    %c0_i32_0 = arith.constant 0 : i32
    return %arg0, %c0_i32 : i32, i32
  }
}

</mosaic_0001>

<bundles_post_ra>
// kernel: feature_embedding_forward.1
= control target key start
LH: loop header
LB: loop body
LE: loop exit
PB: predicated region body
PF: predicated region fallthrough
CT: control target
= control target key end

     0   :  { %15 = vsyncpa [#allocation3], 0  ;;  %s1199_s0 = inlined_call_operand.vmem [shape: f32[16,12], index: 0, kind: input, shape index: {}]   ;;  %s1200_s1 = inlined_call_operand.hbm [shape: f32[12,128], index: 1, kind: input, shape index: {}]   ;;  %s1201_s2 = inlined_call_operand.hbm [shape: f32[1,128], index: 2, kind: input, shape index: {}]   ;;  %s1202_s3 = inlined_call_operand.vmem [shape: f32[128,128], index: 3, kind: input, shape index: {}]   ;;  %s1203_s4 = inlined_call_operand.hbm [shape: f32[1,128], index: 4, kind: input, shape index: {}]   ;;  %s1204_s5 = inlined_call_operand.vmem [shape: f32[128,64], index: 5, kind: input, shape index: {}]   ;;  %s1205_s6 = inlined_call_operand.hbm [shape: f32[1,64], index: 6, kind: input, shape index: {}]   ;;  %s1206_s7 = inlined_call_operand.hbm [shape: f32[1,64], index: 7, kind: input, shape index: {}]   ;;  %s1207_s8 = inlined_call_operand.hbm [shape: f32[1,64], index: 8, kind: input, shape index: {}]   ;;  %s1208_s9 = inlined_call_operand.vmem [shape: f32[64,64], index: 9, kind: input, shape index: {}]   ;;  %s1209_s10 = inlined_call_operand.hbm [shape: f32[16,64], index: 10, kind: output, shape index: {}]  }
   0x1   :  { %16 = vsyncpa [#allocation6], 0 }
   0x2   :  { %17 = vsyncpa [#allocation9], 0 }
   0x3   :  { %18 = vsyncpa [#allocation12], 0 }
   0x4   :  { %19 = vsyncpa [#allocation4], 0  ;;  %s974_s13 = smov [#allocation5]   ;;  %s975_s15 = smov [#allocation8]  }
   0x5   :  { %s40_s14 = sshll.u32 %s974_s13, 4  ;;  %s64_s16 = sshll.u32 %s975_s15, 4  ;;  %s41_s14 = int_to_ptr.vmem [resolvable:$true] %s40_s14  ;;  %s65_s16 = int_to_ptr.vmem [resolvable:$true] %s64_s16 }
   0x6   :  { %s832_s17 = scalar_lea.vmem %s41_s14, 16  ;;  %s836_s18 = scalar_lea.vmem %s41_s14, 32 }
   0x7   :  { %p833_p0 = scmp.ne.s32.totalorder %s41_s14, %s832_s17  ;;  %p837_p1 = scmp.lt.s32.totalorder %s41_s14, %s41_s14 }
   0x8   :  { %p838_p2 = scmp.lt.s32.totalorder %s836_s18, %s832_s17 }
   0xa   :  { %p839_p3 = por %p838_p2, %p837_p1 }
   0xc   :  { %p840_p4 = pnand %p839_p3, %p833_p0 }
   0xe   :  { %843 = shalt.err (!%p840_p4)
}
   0xf   :  { %43 = dma.hbm_to_vmem [thread:$0]  %s1201_s2, 16, %s41_s14, [#allocation6]  }
  0x10   :  { %s852_s21 = scalar_lea.vmem %s65_s16, 16  ;;  %s856_s22 = scalar_lea.vmem %s65_s16, 32 }
  0x11   :  { %p853_p5 = scmp.ne.s32.totalorder %s65_s16, %s852_s21  ;;  %p857_p6 = scmp.lt.s32.totalorder %s65_s16, %s65_s16 }
  0x12   :  { %p858_p7 = scmp.lt.s32.totalorder %s856_s22, %s852_s21 }
  0x14   :  { %p859_p8 = por %p858_p7, %p857_p6 }
  0x16   :  { %p860_p9 = pnand %p859_p8, %p853_p5 }
  0x18   :  { %863 = shalt.err (!%p860_p9)
}
  0x19   :  { %67 = dma.hbm_to_vmem [thread:$0]  %s1205_s6, 16, %s65_s16, [#allocation9]  }
  0x1a   :  { %s976_s25 = smov [#allocation2]  }
  0x1b   :  { %s27_s26 = sshll.u32 %s976_s25, 4  ;;  %s28_s26 = int_to_ptr.vmem [resolvable:$true] %s27_s26 }
  0x1c   :  { %s872_s27 = scalar_lea.vmem %s28_s26, 256  ;;  %p877_p11 = scmp.lt.s32.totalorder %s28_s26, %s28_s26 }
  0x1d   :  { %p873_p10 = scmp.ne.s32.totalorder %s28_s26, %s872_s27  ;;  %p878_p12 = scmp.lt.s32.totalorder %s872_s27, %s872_s27 }
  0x1f   :  { %p879_p13 = por %p878_p12, %p877_p11 }
  0x21   :  { %p880_p0 = pnand %p879_p13, %p873_p10 }
  0x23   :  { %883 = shalt.err (!%p880_p0)
}
  0x24   :  { %s977_s2 = smov 128   ;;  %s978_s28 = smov 8  }
  0x25   :  { %33 = dma.hbm_to_vmem [thread:$0]  %s1200_s1, 256, %s28_s26, [#allocation3], %s977_s2, %s977_s2, %s978_s28  }
  0x26   :  { %s979_s6 = smov [#allocation7]   ;;  %s980_s12 = smov [#allocation10]  }
  0x27   :  { %s52_s11 = sshll.u32 %s979_s6, 4  ;;  %s74_s13 = sshll.u32 %s980_s12, 4  ;;  %s53_s11 = int_to_ptr.vmem [resolvable:$true] %s52_s11  ;;  %s75_s13 = int_to_ptr.vmem [resolvable:$true] %s74_s13 }
  0x28   :  { %s892_s14 = scalar_lea.vmem %s53_s11, 16  ;;  %s896_s15 = scalar_lea.vmem %s53_s11, 32 }
  0x29   :  { %p893_p1 = scmp.ne.s32.totalorder %s53_s11, %s892_s14  ;;  %p897_p2 = scmp.lt.s32.totalorder %s53_s11, %s53_s11 }
  0x2a   :  { %p898_p3 = scmp.lt.s32.totalorder %s896_s15, %s892_s14 }
  0x2c   :  { %p899_p4 = por %p898_p3, %p897_p2 }
  0x2e   :  { %p900_p5 = pnand %p899_p4, %p893_p1 }
  0x30   :  { %903 = shalt.err (!%p900_p5)
}
  0x31   :  { %55 = dma.hbm_to_vmem [thread:$0]  %s1203_s4, 16, %s53_s11, [#allocation6]  }
  0x32   :  { %s912_s18 = scalar_lea.vmem %s75_s13, 16  ;;  %s916_s1 = scalar_lea.vmem %s75_s13, 32 }
  0x33   :  { %p913_p6 = scmp.ne.s32.totalorder %s75_s13, %s912_s18  ;;  %p917_p7 = scmp.lt.s32.totalorder %s75_s13, %s75_s13 }
  0x34   :  { %p918_p8 = scmp.lt.s32.totalorder %s916_s1, %s912_s18 }
  0x36   :  { %p919_p9 = por %p918_p8, %p917_p7 }
  0x38   :  { %p920_p10 = pnand %p919_p9, %p913_p6 }
  0x3a   :  { %923 = shalt.err (!%p920_p10)
}
  0x3b   :  { %77 = dma.hbm_to_vmem [thread:$0]  %s1206_s7, 16, %s75_s13, [#allocation9]  }
  0x3c   :  { %s981_s21 = smov [#allocation11]  }
  0x3d   :  { %s84_s22 = sshll.u32 %s981_s21, 4  ;;  %s85_s22 = int_to_ptr.vmem [resolvable:$true] %s84_s22 }
  0x3e   :  { %s932_s23 = scalar_lea.vmem %s85_s22, 16  ;;  %s936_s24 = scalar_lea.vmem %s85_s22, 32 }
  0x3f   :  { %p933_p11 = scmp.ne.s32.totalorder %s85_s22, %s932_s23  ;;  %p937_p12 = scmp.lt.s32.totalorder %s85_s22, %s85_s22 }
  0x40   :  { %p938_p13 = scmp.lt.s32.totalorder %s936_s24, %s932_s23 }
  0x42   :  { %p939_p0 = por %p938_p13, %p937_p12 }
  0x44   :  { %p940_p1 = pnand %p939_p0, %p933_p11 }
  0x46   :  { %943 = shalt.err (!%p940_p1)
}
  0x47   :  { %87 = dma.hbm_to_vmem [thread:$0]  %s1207_s8, 16, %s85_s22, [#allocation12]  }
  0x48   :  { %964 = dma.done.wait [#allocation3], 256  }
  0x49   :  { %965 = vsyncadd [#allocation3], 4294967040 }
  0x4a   :  { %966 = dma.done.wait [#allocation6], 32  }
  0x4b   :  { %967 = vsyncadd [#allocation6], 4294967264 }
  0x4c   :  { %968 = dma.done.wait [#allocation9], 32  }
  0x4d   :  { %969 = vsyncadd [#allocation9], 4294967264 }
  0x4e   :  { %970 = dma.done.wait [#allocation12], 16  }
  0x4f   :  { %971 = vsyncadd [#allocation12], 4294967280  ;;  %vm126_vm0 = vcmask 1043456   ;;  %vm119_vm1 = vcmask 97280   ;;  %v111_v0 = vld [vmem:[#allocation2 + $0x8] sm:$0xf] }
  0x50   :  { %v110_v1 = vld [vmem:[#allocation2] sm:$0xff]  ;;  %696 = vmatprep.subr.msk.mxu0 %vm126_vm0, %v111_v0  ;;  %v222_v3 = vld [vmem:[%s1202_s3 + $0x78] sm:$0xff]  ;;  %v221_v4 = vld [vmem:[%s1202_s3 + $0x70] sm:$0xff]  ;;  %vm413_vm2 = vcmask 523264  }
  0x51   :  { %v108_v2 = vld [vmem:[%s1199_s0] sm:$0xff]  ;;  %697 = vmatpush3.msk.msra.mxu0 %vm126_vm0, %v111_v0  ;;  %v109_v5 = vld [vmem:[%s1199_s0 + $0x8] sm:$0xff]  ;;  %703 = vmatprep.subr.mxu1 %v222_v3  ;;  %v218_v8 = vld [vmem:[%s1202_s3 + $0x58] sm:$0xff] }
  0x52   :  { %700 = vmatprep.mubr.msk.f32.mxu0 %vm119_vm1, %v108_v2  ;;  %698 = vmatprep.subr.mxu0 %v110_v1  ;;  %v220_v6 = vld [vmem:[%s1202_s3 + $0x68] sm:$0xff]  ;;  %v219_v7 = vld [vmem:[%s1202_s3 + $0x60] sm:$0xff]  ;;  %v217_v9 = vld [vmem:[%s1202_s3 + $0x50] sm:$0xff] }
  0x53   :  { %704 = vmatpush3.msra.mxu1 %v222_v3  ;;  %699 = vmatpush3.msra.mxu0 %v110_v1  ;;  %v216_v10 = vld [vmem:[%s1202_s3 + $0x48] sm:$0xff]  ;;  %v215_v11 = vld [vmem:[%s1202_s3 + $0x40] sm:$0xff]  ;;  %v214_v12 = vld [vmem:[%s1202_s3 + $0x38] sm:$0xff] }
  0x54   :  { %705 = vmatprep.subr.mxu1 %v221_v4  ;;  %701 = vmatmul.mubr.msk.f32.vlgmr.msra.gmra.mxu0 %vm119_vm1, %v109_v5  ;;  %v213_v13 = vld [vmem:[%s1202_s3 + $0x30] sm:$0xff]  ;;  %v212_v14 = vld [vmem:[%s1202_s3 + $0x28] sm:$0xff]  ;;  %v211_v15 = vld [vmem:[%s1202_s3 + $0x20] sm:$0xff] }
  0x55   :  { %706 = vmatpush3.msra.mxu1 %v221_v4  ;;  %v210_v16 = vld [vmem:[%s1202_s3 + $0x18] sm:$0xff]  ;;  %v209_v17 = vld [vmem:[%s1202_s3 + $0x10] sm:$0xff]  ;;  %v208_v18 = vld [vmem:[%s1202_s3 + $0x8] sm:$0xff] }
  0x56   :  { %707 = vmatprep.subr.mxu1 %v220_v6  ;;  %v207_v19 = vld [vmem:[%s1202_s3] sm:$0xff]  ;;  %v322_v20 = vld [vmem:[%s1204_s5 + $0x78] sm:$0xff]  ;;  %v321_v21 = vld [vmem:[%s1204_s5 + $0x70] sm:$0xff] }
  0x57   :  { %708 = vmatpush3.msra.mxu1 %v220_v6  ;;  %738 = vmatprep.subr.mxu0 %v322_v20  ;;  %v320_v22 = vld [vmem:[%s1204_s5 + $0x68] sm:$0xff]  ;;  %v319_v23 = vld [vmem:[%s1204_s5 + $0x60] sm:$0xff]  ;;  %v318_v24 = vld [vmem:[%s1204_s5 + $0x58] sm:$0xff] }
  0x58   :  { %709 = vmatprep.subr.mxu1 %v219_v7  ;;  %739 = vmatpush3.msra.mxu0 %v322_v20  ;;  %v317_v25 = vld [vmem:[%s1204_s5 + $0x50] sm:$0xff]  ;;  %v316_v26 = vld [vmem:[%s1204_s5 + $0x48] sm:$0xff]  ;;  %v315_v27 = vld [vmem:[%s1204_s5 + $0x40] sm:$0xff] }
  0x59   :  { %710 = vmatpush3.msra.mxu1 %v219_v7  ;;  %740 = vmatprep.subr.mxu0 %v321_v21  ;;  %v314_v28 = vld [vmem:[%s1204_s5 + $0x38] sm:$0xff]  ;;  %v313_v29 = vld [vmem:[%s1204_s5 + $0x30] sm:$0xff]  ;;  %v312_v30 = vld [vmem:[%s1204_s5 + $0x28] sm:$0xff] }
  0x5a   :  { %711 = vmatprep.subr.mxu1 %v218_v8  ;;  %741 = vmatpush3.msra.mxu0 %v321_v21  ;;  %v311_v31 = vld [vmem:[%s1204_s5 + $0x20] sm:$0xff]  ;;  %v624_v32 = vld [vmem:[#allocation5] ss:$0 sm:$0xff]  ;;  %v310_v39 = vld [vmem:[%s1204_s5 + $0x18] sm:$0xff] }
  0x5b   :  { %712 = vmatpush3.msra.mxu1 %v218_v8  ;;  %742 = vmatprep.subr.mxu0 %v320_v22  ;;  %v309_v40 = vld [vmem:[%s1204_s5 + $0x10] sm:$0xff]  ;;  %v308_v41 = vld [vmem:[%s1204_s5 + $0x8] sm:$0xff]  ;;  %v307_v42 = vld [vmem:[%s1204_s5] sm:$0xff] }
  0x5c   :  { %713 = vmatprep.subr.mxu1 %v217_v9  ;;  %743 = vmatpush3.msra.mxu0 %v320_v22  ;;  %v412_v43 = vld [vmem:[%s1208_s9 + $0x38] sm:$0xff]  ;;  %v411_v44 = vld [vmem:[%s1208_s9 + $0x30] sm:$0xff]  ;;  %v410_v45 = vld [vmem:[%s1208_s9 + $0x28] sm:$0xff] }
  0x5d   :  { %714 = vmatpush3.msra.mxu1 %v217_v9  ;;  %744 = vmatprep.subr.mxu0 %v319_v23  ;;  %v409_v46 = vld [vmem:[%s1208_s9 + $0x20] sm:$0xff]  ;;  %v408_v47 = vld [vmem:[%s1208_s9 + $0x18] sm:$0xff]  ;;  %v628_v48 = vld [vmem:[#allocation7] ss:$0 sm:$0xff] }
  0x5e   :  { %715 = vmatprep.subr.mxu1 %v216_v10  ;;  %745 = vmatpush3.msra.mxu0 %v319_v23  ;;  %v407_v55 = vld [vmem:[%s1208_s9 + $0x10] sm:$0xff]  ;;  %v406_v56 = vld [vmem:[%s1208_s9 + $0x8] sm:$0xff]  ;;  %v405_v57 = vld [vmem:[%s1208_s9] sm:$0xff]  ;;  %s982_s9 = smov [#allocation13]  }
  0x5f   :  { %716 = vmatpush3.msra.mxu1 %v216_v10  ;;  %746 = vmatprep.subr.mxu0 %v318_v24  ;;  %v629_v59 = vld [vmem:[#allocation8] ss:$0 sm:$0xff]  ;;  %v634_v10 = vld [vmem:[#allocation10] ss:$0 sm:$0xff]  ;;  %s609_s6 = sshll.u32 %s982_s9, 4  ;;  %s610_s6 = int_to_ptr.vmem [resolvable:$true] %s609_s6 }
  0x60   :  { %717 = vmatprep.subr.mxu1 %v215_v11  ;;  %747 = vmatpush3.msra.mxu0 %v318_v24  ;;  %s944_s11 = scalar_lea.vmem %s610_s6, 256  ;;  %p949_p3 = scmp.lt.s32.totalorder %s610_s6, %s610_s6 }
  0x61   :  { %718 = vmatpush3.msra.mxu1 %v215_v11  ;;  %748 = vmatprep.subr.mxu0 %v317_v25  ;;  %p945_p2 = scmp.ne.s32.totalorder %s610_s6, %s944_s11  ;;  %p950_p4 = scmp.lt.s32.totalorder %s944_s11, %s944_s11 }
  0x62   :  { %719 = vmatprep.subr.mxu1 %v214_v12  ;;  %749 = vmatpush3.msra.mxu0 %v317_v25 }
  0x63   :  { %720 = vmatpush3.msra.mxu1 %v214_v12  ;;  %750 = vmatprep.subr.mxu0 %v316_v26  ;;  %p951_p5 = por %p950_p4, %p949_p3 }
  0x64   :  { %721 = vmatprep.subr.mxu1 %v213_v13  ;;  %751 = vmatpush3.msra.mxu0 %v316_v26 }
  0x65   :  { %722 = vmatpush3.msra.mxu1 %v213_v13  ;;  %752 = vmatprep.subr.mxu0 %v315_v27  ;;  %v635_v13 = vld [vmem:[#allocation11] ss:$0 sm:$0xff]  ;;  %p952_p6 = pnand %p951_p5, %p945_p2 }
  0x66   :  { %723 = vmatprep.subr.mxu1 %v212_v14  ;;  %753 = vmatpush3.msra.mxu0 %v315_v27 }
  0x67   :  { %724 = vmatpush3.msra.mxu1 %v212_v14  ;;  %754 = vmatprep.subr.mxu0 %v314_v28 }
  0x68   :  { %725 = vmatprep.subr.mxu1 %v211_v15  ;;  %755 = vmatpush3.msra.mxu0 %v314_v28 }
  0x69   :  { %726 = vmatpush3.msra.mxu1 %v211_v15  ;;  %756 = vmatprep.subr.mxu0 %v313_v29 }
  0x6a   :  { %727 = vmatprep.subr.mxu1 %v210_v16  ;;  %757 = vmatpush3.msra.mxu0 %v313_v29 }
  0x6b   :  { %728 = vmatpush3.msra.mxu1 %v210_v16  ;;  %758 = vmatprep.subr.mxu0 %v312_v30 }
  0x6c   :  { %729 = vmatprep.subr.mxu1 %v209_v17  ;;  %759 = vmatpush3.msra.mxu0 %v312_v30 }
  0x6d   :  { %730 = vmatpush3.msra.mxu1 %v209_v17  ;;  %760 = vmatprep.subr.mxu0 %v311_v31 }
  0x6e   :  { %731 = vmatprep.subr.mxu1 %v208_v18  ;;  %761 = vmatpush3.msra.mxu0 %v311_v31 }
  0x6f   :  { %732 = vmatpush3.msra.mxu1 %v208_v18  ;;  %762 = vmatprep.subr.mxu0 %v310_v39 }
  0x70   :  { %733 = vmatprep.subr.mxu1 %v207_v19  ;;  %763 = vmatpush3.msra.mxu0 %v310_v39 }
  0x71   :  { %734 = vmatpush3.msra.mxu1 %v207_v19  ;;  %764 = vmatprep.subr.mxu0 %v309_v40 }
  0x72   :  { %765 = vmatpush3.msra.mxu0 %v309_v40  ;;  %773 = vmatprep.subr.mxu1 %v412_v43 }
  0x73   :  { %766 = vmatprep.subr.mxu0 %v308_v41 }
  0x74   :  { %767 = vmatpush3.msra.mxu0 %v308_v41 }
  0x75   :  { %768 = vmatprep.subr.mxu0 %v307_v42 }
  0x76   :  { %769 = vmatpush3.msra.mxu0 %v307_v42 }
  0x77   :  { %792 = vmatprep.subr.mxu0 %v412_v43 }
 0x114   :  { %v702_v33 = vpop.f32.mrf.mxu0 }
 0x115   :  { %v202_v34 = vadd.f32 %v702_v33, %v624_v32 }
 0x116   :  { %v196_v35 = vpop.f32.mrf.mxu0 }
 0x117   :  { %v197_v36 = vadd.f32 %v624_v32, %v196_v35  ;;  %v206_v38 = vmax.f32 %v202_v34, 0.0 }
 0x119   :  { %v205_v37 = vmax.f32 %v197_v36, 0.0 }
 0x11b   :  { %735 = vmatprep.mubr.f32.mxu1 %v205_v37 }
 0x11c   :  { %736 = vmatmul.mubr.f32.vlgmr.msra.gmra.mxu1 %v206_v38 }
 0x11d   :  { %774 = vmatpush3.msra.mxu1 %v412_v43 }
 0x11e   :  { %775 = vmatprep.subr.mxu1 %v411_v44 }
 0x11f   :  { %776 = vmatpush3.msra.mxu1 %v411_v44 }
 0x120   :  { %777 = vmatprep.subr.mxu1 %v410_v45 }
 0x121   :  { %778 = vmatpush3.msra.mxu1 %v410_v45 }
 0x122   :  { %779 = vmatprep.subr.mxu1 %v409_v46 }
 0x123   :  { %780 = vmatpush3.msra.mxu1 %v409_v46 }
 0x124   :  { %781 = vmatprep.subr.mxu1 %v408_v47 }
 0x125   :  { %782 = vmatpush3.msra.mxu1 %v408_v47 }
 0x126   :  { %783 = vmatprep.subr.mxu1 %v407_v55 }
 0x127   :  { %784 = vmatpush3.msra.mxu1 %v407_v55 }
 0x128   :  { %785 = vmatprep.subr.mxu1 %v406_v56 }
 0x129   :  { %786 = vmatpush3.msra.mxu1 %v406_v56 }
 0x12a   :  { %787 = vmatprep.subr.mxu1 %v405_v57 }
 0x12b   :  { %788 = vmatpush3.msra.mxu1 %v405_v57 }
 0x1dc   :  { %v737_v49 = vpop.f32.mrf.mxu1 }
 0x1dd   :  { %v302_v50 = vadd.f32 %v737_v49, %v628_v48 }
 0x1de   :  { %v296_v51 = vpop.f32.mrf.mxu1 }
 0x1df   :  { %v297_v52 = vadd.f32 %v628_v48, %v296_v51  ;;  %v306_v54 = vmax.f32 %v302_v50, 0.0 }
 0x1e1   :  { %v305_v53 = vmax.f32 %v297_v52, 0.0 }
 0x1e3   :  { %770 = vmatprep.mubr.f32.mxu0 %v305_v53 }
 0x1e4   :  { %771 = vmatmul.mubr.f32.vlgmr.msra.gmra.mxu0 %v306_v54 }
 0x1e5   :  { %793 = vmatpush3.msra.mxu0 %v412_v43 }
 0x1e6   :  { %794 = vmatprep.subr.mxu0 %v411_v44 }
 0x1e7   :  { %795 = vmatpush3.msra.mxu0 %v411_v44 }
 0x1e8   :  { %796 = vmatprep.subr.mxu0 %v410_v45 }
 0x1e9   :  { %797 = vmatpush3.msra.mxu0 %v410_v45 }
 0x1ea   :  { %798 = vmatprep.subr.mxu0 %v409_v46 }
 0x1eb   :  { %799 = vmatpush3.msra.mxu0 %v409_v46 }
 0x1ec   :  { %800 = vmatprep.subr.mxu0 %v408_v47 }
 0x1ed   :  { %801 = vmatpush3.msra.mxu0 %v408_v47 }
 0x1ee   :  { %802 = vmatprep.subr.mxu0 %v407_v55 }
 0x1ef   :  { %803 = vmatpush3.msra.mxu0 %v407_v55 }
 0x1f0   :  { %804 = vmatprep.subr.mxu0 %v406_v56 }
 0x1f1   :  { %805 = vmatpush3.msra.mxu0 %v406_v56 }
 0x1f2   :  { %806 = vmatprep.subr.mxu0 %v405_v57 }
 0x1f3   :  { %807 = vmatpush3.msra.mxu0 %v405_v57 }
 0x2a4   :  { %v772_v58 = vpop.f32.mrf.mxu0 }
 0x2a5   :  { %v402_v62 = vadd.f32 %v772_v58, %v629_v59 }
 0x2a6   :  { %v396_v60 = vpop.f32.mrf.mxu0 }
 0x2a7   :  { %v397_v61 = vadd.f32 %v629_v59, %v396_v60 }
 0x2a9   :  { %789 = vmatprep.mubr.msk.f32.mxu1 %vm413_vm2, %v397_v61 }
 0x2aa   :  { %790 = vmatmul.mubr.msk.f32.vlgmr.msra.gmra.mxu1 %vm413_vm2, %v402_v62 }
 0x36a   :  { %v791_v63 = vpop.f32.mrf.mxu1 }
 0x36b   :  { %v496_v0 = vsub.f32 %v402_v62, %v791_v63 }
 0x36c   :  { %v486_v1 = vpop.f32.mrf.mxu1 }
 0x36d   :  { %v495_v2 = vsub.f32 %v397_v61, %v486_v1  ;;  %v498_v4 = vmul.f32 %v496_v0, %v496_v0 }
 0x36f   :  { %v497_v3 = vmul.f32 %v495_v2, %v495_v2 }
 0x371   :  { %808 = vmatprep.mubr.msk.f32.mxu0 %vm413_vm2, %v497_v3 }
 0x372   :  { %809 = vmatmul.mubr.msk.f32.vlgmr.msra.gmra.mxu0 %vm413_vm2, %v498_v4 }
 0x432   :  { %v810_v5 = vpop.f32.mrf.mxu0 }
 0x433   :  { %v577_v6 = vadd.f32 1e-05, %v810_v5 }
 0x434   :  { %v571_v7 = vpop.f32.mrf.mxu0 }
 0x435   :  { %820 = vrsqrt.f32 %v577_v6  ;;  %v572_v8 = vadd.f32 1e-05, %v571_v7 }
 0x437   :  { %822 = vrsqrt.f32 %v572_v8 }
 0x442   :  { %v821_v9 = vpop.eup %820 }
 0x443   :  { %v583_v11 = vmul.f32 %v821_v9, %v496_v0 }
 0x444   :  { %v823_v12 = vpop.eup %822 }
 0x445   :  { %v582_v14 = vmul.f32 %v823_v12, %v495_v2  ;;  %v592_v15 = vmul.f32 %v634_v10, %v583_v11 }
 0x447   :  { %v591_v16 = vmul.f32 %v634_v10, %v582_v14  ;;  %v601_v17 = vadd.f32 %v635_v13, %v592_v15 }
 0x449   :  { %v600_v18 = vadd.f32 %v635_v13, %v591_v16  ;;  %603 = vst.msk [vmem:[#allocation13 + $0x8] sm:$0xff] %vm413_vm2, %v601_v17 }
 0x44b   :  { %602 = vst.msk [vmem:[#allocation13] sm:$0xff] %vm413_vm2, %v600_v18 }
 0x44c   :  { %955 = shalt.err (!%p952_p6)
}
 0x44d   :  { %615 = dma.vmem_to_hbm [thread:$0]  %s610_s6, 256, %s1209_s10, [#allocation4], %s977_s2, %s977_s2, %s978_s28  }
 0x44e   :  { %972 = dma.done.wait [#allocation4], 256  }
 0x44f   :  { %973 = vsyncadd [#allocation4], 4294967040 }
 0x450   :  { %619 = vsyncpa [#allocation3], 1 }
 0x451   :  { %620 = vsyncpa [#allocation6], 1 }
 0x452   :  { %621 = vsyncpa [#allocation9], 1 }
 0x453   :  { %622 = vsyncpa [#allocation12], 1 }
 0x454   :  { %623 = vsyncpa [#allocation4], 1 }

</bundles_post_ra>
